<compile_context>
chip_gen: v7x
topology: tpu7x:2x2x1
jax: 0.10.0
libtpu: 0.0.40
codegen_flags: <defaults>
</compile_context>

<pallas_src>
import math

import jax
import jax.numpy as jnp
import numpy as np
from jax.experimental import pallas as pl
from jax.experimental.pallas import tpu as pltpu


def make_curricular_face_kernel(batch, m=0.5, s=64.0):
    cos_m = math.cos(m)
    sin_m = math.sin(m)
    threshold = math.cos(math.pi - m)
    mm = math.sin(math.pi - m) * m
    inv_b = 1.0 / float(batch)

    def kernel(labels_ref, t_ref, feats_ref, weight_ref, out_ref, t_out_ref):
        feats = feats_ref[...]           # (B, D) f32, VMEM
        w = weight_ref[...]              # (D, C) f32, VMEM
        labels = labels_ref[...]         # (B, 1) i32, VMEM
        t_old = t_ref[0]                 # scalar f32, SMEM

        # --- deferred L2 normalization --------------------------------------
        # F.normalize(feats, dim=1) @ F.normalize(kernel, dim=0) is computed as
        # (feats @ kernel) scaled by the inverse row/column norms of the small
        # (B, C) product; no normalized copy of the weight is materialized.
        f_sq = jnp.sum(feats * feats, axis=1, keepdims=True)          # (B, 1)
        w_sq = jnp.sum(w * w, axis=0, keepdims=True)                   # (1, C)
        # rsqrt(max(sumsq, 1e-24)) == 1 / max(norm, 1e-12)  (F.normalize eps)
        inv_f = jax.lax.rsqrt(jnp.maximum(f_sq, 1e-24))                # EUP
        inv_w = jax.lax.rsqrt(jnp.maximum(w_sq, 1e-24))                # EUP

        raw = jnp.dot(feats, w, preferred_element_type=jnp.float32)    # MXU
        cos_theta = jnp.clip(raw * inv_f * inv_w, -1.0, 1.0)           # (B, C)

        # target_logit = cos_theta[arange(B), labels]  (gather via one-hot mask)
        col = jax.lax.broadcasted_iota(jnp.int32, cos_theta.shape, 1)  # (B, C)
        onehot = col == labels                                          # (B, C)
        target_logit = jnp.sum(jnp.where(onehot, cos_theta, 0.0),
                               axis=1, keepdims=True)                   # (B, 1)

        sin_theta = jnp.sqrt(1.0 - target_logit * target_logit)
        cos_theta_m = target_logit * cos_m - sin_theta * sin_m
        final_target = jnp.where(target_logit > threshold,
                                 cos_theta_m, target_logit - mm)

        # running buffer update: t = mean(target_logit)*0.01 + 0.99*t
        t_new = jnp.sum(target_logit) * (inv_b * 0.01) + 0.99 * t_old

        # hard-example reweighting with the *updated* t (matches PyTorch order)
        mask = cos_theta > cos_theta_m
        hard = cos_theta * (t_new + cos_theta)
        modified = jnp.where(mask, hard, cos_theta)

        # scatter the margin logit at the label column, then scale by s
        out_ref[...] = jnp.where(onehot, final_target, modified) * s
        t_out_ref[0] = t_new

    return kernel


def curricular_face(feats, weight, labels, t, m=0.5, s=64.0):
    """Pallas implementation of CurricularFace.forward.

    Returns (output_logits (B, C) f32, new_t (1,) f32)."""
    B, D = feats.shape
    D2, C = weight.shape
    assert D == D2
    labels2d = labels.reshape(B, 1).astype(jnp.int32)
    t1d = t.reshape(1).astype(jnp.float32)

    kernel = make_curricular_face_kernel(B, m=m, s=s)
    vmem = pltpu.MemorySpace.VMEM
    smem = pltpu.MemorySpace.SMEM
    out, t_new = pl.pallas_call(
        kernel,
        out_shape=(jax.ShapeDtypeStruct((B, C), jnp.float32),
                   jax.ShapeDtypeStruct((1,), jnp.float32)),
        in_specs=[
            pl.BlockSpec(memory_space=vmem),   # labels (B, 1)
            pl.BlockSpec(memory_space=smem),   # t      (1,)  scalar state
            pl.BlockSpec(memory_space=vmem),   # feats  (B, D)
            pl.BlockSpec(memory_space=vmem),   # weight (D, C)
        ],
        out_specs=(
            pl.BlockSpec(memory_space=vmem),   # logits (B, C)
            pl.BlockSpec(memory_space=smem),   # new t  (1,)
        ),
    )(labels2d, t1d, feats.astype(jnp.float32), weight.astype(jnp.float32))
    return out, t_new


def curricular_face_ref(feats, weight, labels, t, m=0.5, s=64.0):
    """Pure-JAX reference mirroring the PyTorch forward, for validation."""
    cos_m, sin_m = math.cos(m), math.sin(m)
    threshold = math.cos(math.pi - m)
    mm = math.sin(math.pi - m) * m

    w_n = weight / jnp.maximum(jnp.linalg.norm(weight, axis=0, keepdims=True), 1e-12)
    f_n = feats / jnp.maximum(jnp.linalg.norm(feats, axis=1, keepdims=True), 1e-12)
    cos = jnp.clip(f_n @ w_n, -1.0, 1.0)
    tl = jnp.take_along_axis(cos, labels[:, None], axis=1)               # (B, 1)
    sin = jnp.sqrt(1.0 - tl * tl)
    cos_m_t = tl * cos_m - sin * sin_m
    final_t = jnp.where(tl > threshold, cos_m_t, tl - mm)
    t_new = jnp.mean(tl) * 0.01 + 0.99 * t[0]
    mask = cos > cos_m_t
    cos = jnp.where(mask, cos * (t_new + cos), cos)
    onehot = jax.lax.broadcasted_iota(jnp.int32, cos.shape, 1) == labels[:, None]
    out = jnp.where(onehot, final_t, cos) * s
    return out, jnp.reshape(t_new, (1,))


if __name__ == "__main__":
    B, FEAT_DIM, NUM_CLASS = 8, 128, 256

    key = jax.random.PRNGKey(0)
    k_feats, k_weight, k_labels = jax.random.split(key, 3)

    feats = jax.random.normal(k_feats, (B, FEAT_DIM), dtype=jnp.float32)
    # nn.init.normal_(kernel, std=0.01), shape (feat_dim, num_class)
    weight = 0.01 * jax.random.normal(k_weight, (FEAT_DIM, NUM_CLASS), dtype=jnp.float32)
    labels = jax.random.randint(k_labels, (B,), 0, NUM_CLASS, dtype=jnp.int32)
    t_buf = jnp.zeros((1,), dtype=jnp.float32)   # registered buffer 't'

    out, t_new = curricular_face(feats, weight, labels, t_buf)
    jax.block_until_ready((out, t_new))

    ref_out, ref_t = curricular_face_ref(feats, weight, labels, t_buf)
    np.testing.assert_allclose(np.asarray(out), np.asarray(ref_out),
                               rtol=1e-2, atol=5e-2)
    np.testing.assert_allclose(np.asarray(t_new), np.asarray(ref_t),
                               rtol=1e-3, atol=1e-4)

    print("KERNEL_OK")
</pallas_src>

<mosaic_0001>
module attributes {stable_mosaic.version = 11 : i64} {
  func.func @kernel(%arg0: memref<8x1xi32, #tpu.memory_space<vmem>>, %arg1: memref<1xf32, #tpu.memory_space<smem>>, %arg2: memref<8x128xf32, #tpu.memory_space<vmem>>, %arg3: memref<128x256xf32, #tpu.memory_space<vmem>>, %arg4: memref<8x256xf32, #tpu.memory_space<vmem>>, %arg5: memref<1xf32, #tpu.memory_space<smem>>) attributes {dimension_semantics = [], scalar_prefetch = 0 : i64, scratch_operands = 0 : i64, tpu.core_type = #tpu.core_type<tc>} {
    %c0 = arith.constant 0 : index
    %c0_0 = arith.constant 0 : index
    %0 = vector.load %arg2[%c0, %c0_0] : memref<8x128xf32, #tpu.memory_space<vmem>>, vector<8x128xf32>
    %c0_1 = arith.constant 0 : index
    %c0_2 = arith.constant 0 : index
    %1 = vector.load %arg3[%c0_1, %c0_2] : memref<128x256xf32, #tpu.memory_space<vmem>>, vector<128x256xf32>
    %c0_3 = arith.constant 0 : index
    %c0_4 = arith.constant 0 : index
    %2 = vector.load %arg0[%c0_3, %c0_4] : memref<8x1xi32, #tpu.memory_space<vmem>>, vector<8x1xi32>
    %c0_5 = arith.constant 0 : index
    %3 = memref.load %arg1[%c0_5] : memref<1xf32, #tpu.memory_space<smem>>
    %4 = arith.mulf %0, %0 : vector<8x128xf32>
    %cst = arith.constant dense<0.000000e+00> : vector<8xf32>
    %5 = vector.multi_reduction <add>, %4, %cst [1] : vector<8x128xf32> to vector<8xf32>
    %6 = vector.shape_cast %5 : vector<8xf32> to vector<8x1xf32>
    %7 = arith.mulf %1, %1 : vector<128x256xf32>
    %cst_6 = arith.constant dense<0.000000e+00> : vector<256xf32>
    %8 = vector.multi_reduction <add>, %7, %cst_6 [0] : vector<128x256xf32> to vector<256xf32>
    %9 = vector.shape_cast %8 : vector<256xf32> to vector<1x256xf32>
    %cst_7 = arith.constant 1.000000e-24 : f32
    %10 = vector.broadcast %cst_7 : f32 to vector<8x1xf32>
    %11 = arith.maximumf %6, %10 : vector<8x1xf32>
    %12 = math.rsqrt %11 : vector<8x1xf32>
    %cst_8 = arith.constant 1.000000e-24 : f32
    %13 = vector.broadcast %cst_8 : f32 to vector<1x256xf32>
    %14 = arith.maximumf %9, %13 : vector<1x256xf32>
    %15 = math.rsqrt %14 : vector<1x256xf32>
    %cst_9 = arith.constant dense<0.000000e+00> : vector<8x256xf32>
    %16 = tpu.matmul %0, %1, %cst_9 {dimension_numbers = #tpu.dot_dimension_numbers<[1], [0], [0], [1], [0, 0, 1, 1], [], []>} : vector<8x128xf32>, vector<128x256xf32>, vector<8x256xf32> -> vector<8x256xf32>
    %17 = vector.broadcast %12 : vector<8x1xf32> to vector<8x256xf32>
    %18 = arith.mulf %16, %17 : vector<8x256xf32>
    %19 = vector.broadcast %15 : vector<1x256xf32> to vector<8x256xf32>
    %20 = arith.mulf %18, %19 : vector<8x256xf32>
    %cst_10 = arith.constant -1.000000e+00 : f32
    %cst_11 = arith.constant 1.000000e+00 : f32
    %21 = vector.broadcast %cst_10 : f32 to vector<8x256xf32>
    %22 = arith.maximumf %21, %20 : vector<8x256xf32>
    %23 = vector.broadcast %cst_11 : f32 to vector<8x256xf32>
    %24 = arith.minimumf %23, %22 : vector<8x256xf32>
    %25 = tpu.iota {dimensions = array<i32: 1>} : vector<8x256xi32>
    %26 = vector.broadcast %2 : vector<8x1xi32> to vector<8x256xi32>
    %27 = arith.cmpi eq, %25, %26 : vector<8x256xi32>
    %cst_12 = arith.constant 0.000000e+00 : f32
    %28 = vector.broadcast %cst_12 : f32 to vector<8x256xf32>
    %29 = arith.select %27, %24, %28 : vector<8x256xi1>, vector<8x256xf32>
    %cst_13 = arith.constant dense<0.000000e+00> : vector<8xf32>
    %30 = vector.multi_reduction <add>, %29, %cst_13 [1] : vector<8x256xf32> to vector<8xf32>
    %31 = vector.shape_cast %30 : vector<8xf32> to vector<8x1xf32>
    %32 = arith.mulf %31, %31 : vector<8x1xf32>
    %cst_14 = arith.constant 1.000000e+00 : f32
    %33 = vector.broadcast %cst_14 : f32 to vector<8x1xf32>
    %34 = arith.subf %33, %32 : vector<8x1xf32>
    %35 = math.sqrt %34 : vector<8x1xf32>
    %cst_15 = arith.constant 0.87758255 : f32
    %36 = vector.broadcast %cst_15 : f32 to vector<8x1xf32>
    %37 = arith.mulf %31, %36 : vector<8x1xf32>
    %cst_16 = arith.constant 0.47942555 : f32
    %38 = vector.broadcast %cst_16 : f32 to vector<8x1xf32>
    %39 = arith.mulf %35, %38 : vector<8x1xf32>
    %40 = arith.subf %37, %39 : vector<8x1xf32>
    %cst_17 = arith.constant -0.87758255 : f32
    %41 = vector.broadcast %cst_17 : f32 to vector<8x1xf32>
    %42 = arith.cmpf ogt, %31, %41 : vector<8x1xf32>
    %cst_18 = arith.constant 0.239712775 : f32
    %43 = vector.broadcast %cst_18 : f32 to vector<8x1xf32>
    %44 = arith.subf %31, %43 : vector<8x1xf32>
    %45 = arith.select %42, %40, %44 : vector<8x1xi1>, vector<8x1xf32>
    %46 = vector.shape_cast %31 : vector<8x1xf32> to vector<1x8x1xf32>
    %cst_19 = arith.constant dense<0.000000e+00> : vector<1xf32>
    %47 = vector.multi_reduction <add>, %46, %cst_19 [1, 2] : vector<1x8x1xf32> to vector<1xf32>
    %48 = vector.shape_cast %47 : vector<1xf32> to vector<1x1x1xf32>
    %49 = vector.extract %48[0, 0, 0] : f32 from vector<1x1x1xf32>
    %cst_20 = arith.constant 1.250000e-03 : f32
    %50 = arith.mulf %49, %cst_20 : f32
    %cst_21 = arith.constant 9.900000e-01 : f32
    %51 = arith.mulf %cst_21, %3 : f32
    %52 = arith.addf %50, %51 : f32
    %53 = vector.broadcast %40 : vector<8x1xf32> to vector<8x256xf32>
    %54 = arith.cmpf ogt, %24, %53 : vector<8x256xf32>
    %55 = vector.broadcast %52 : f32 to vector<8x256xf32>
    %56 = arith.addf %55, %24 : vector<8x256xf32>
    %57 = arith.mulf %24, %56 : vector<8x256xf32>
    %58 = arith.select %54, %57, %24 : vector<8x256xi1>, vector<8x256xf32>
    %59 = vector.shape_cast %45 : vector<8x1xf32> to vector<8x1xf32>
    %60 = vector.broadcast %59 : vector<8x1xf32> to vector<8x256xf32>
    %61 = arith.select %27, %60, %58 : vector<8x256xi1>, vector<8x256xf32>
    %cst_22 = arith.constant 6.400000e+01 : f32
    %62 = vector.broadcast %cst_22 : f32 to vector<8x256xf32>
    %63 = arith.mulf %61, %62 : vector<8x256xf32>
    %c0_23 = arith.constant 0 : index
    %c0_24 = arith.constant 0 : index
    %64 = vector.load %arg4[%c0_23, %c0_24] : memref<8x256xf32, #tpu.memory_space<vmem>>, vector<8x256xf32>
    tpu.vector_store %arg4[%c0_23, %c0_24], %63 {strides = array<i32>} : memref<8x256xf32, #tpu.memory_space<vmem>>, vector<8x256xf32>,
    %c0_25 = arith.constant 0 : index
    %65 = memref.load %arg5[%c0_25] : memref<1xf32, #tpu.memory_space<smem>>
    memref.store %52, %arg5[%c0_25] : memref<1xf32, #tpu.memory_space<smem>>
    return
  }
}

</mosaic_0001>

<bundles_post_ra>
// kernel: tpu_custom_call.1
= control target key start
LH: loop header
LB: loop body
LE: loop exit
PB: predicated region body
PF: predicated region fallthrough
CT: control target
= control target key end

     0   :  { %12 = vsyncpa [#allocation4], 0  ;;  %s538_s0 = inlined_call_operand.vmem [shape: s32[8,1], index: 0, kind: input, shape index: {}]   ;;  %s539_s1 = inlined_call_operand.<no memory space> [shape: f32[1], index: 1, kind: input, shape index: {}]   ;;  %s540_s2 = inlined_call_operand.vmem [shape: f32[8,128], index: 2, kind: input, shape index: {}]   ;;  %s541_s3 = inlined_call_operand.hbm [shape: f32[128,256], index: 3, kind: input, shape index: {}]   ;;  %s542_s4 = inlined_call_operand.hbm [shape: f32[8,256], index: 4, kind: output, shape index: {0}]   ;;  %s543_s5 = inlined_call_operand.hbm [shape: f32[1], index: 5, kind: output, shape index: {1}]  }
   0x1   :  { %13 = vsyncpa [#allocation5], 0 }
   0x2   :  { %14 = vsyncpa [#allocation6], 0  ;;  %s433_s18 = smov [#allocation3]   ;;  %s373_s22 = scalar_lea.hbm %s541_s3, 4096 }
   0x3   :  { %s26_s19 = sshll.u32 %s433_s18, 4  ;;  %p374_p0 = scmp.ne.s32.totalorder %s541_s3, %s373_s22  ;;  %s27_s19 = int_to_ptr.vmem [resolvable:$true] %s26_s19 }
   0x4   :  { %p377_p1 = scmp.lt.u32.totalorder %s373_s22, %s541_s3 }
   0x6   :  { %p379_p2 = pnand %p377_p1, %p374_p0 }
   0x8   :  { %382 = shalt.err (!%p379_p2)
}
   0x9   :  { %s383_s27 = scalar_lea.vmem %s27_s19, 4096  ;;  %p388_p4 = scmp.lt.s32.totalorder %s27_s19, %s27_s19 }
   0xa   :  { %p384_p3 = scmp.ne.s32.totalorder %s27_s19, %s383_s27  ;;  %p389_p5 = scmp.lt.s32.totalorder %s383_s27, %s383_s27 }
   0xc   :  { %p390_p6 = por %p389_p5, %p388_p4 }
   0xe   :  { %p391_p7 = pnand %p390_p6, %p384_p3 }
  0x10   :  { %394 = shalt.err (!%p391_p7)
}
  0x11   :  { %s434_s28 = smov 256   ;;  %s435_s29 = smov 16  }
  0x12   :  { %32 = dma.hbm_to_vmem [thread:$0]  %s541_s3, 4096, %s27_s19, [#allocation4], %s434_s28, %s434_s28, %s435_s29  }
  0x13   :  { %427 = dma.done.wait [#allocation4], 4096  }
  0x14   :  { %428 = vsyncadd [#allocation4], 4294963200  ;;  %v436_v0 = vmov 0.0   ;;  %v437_v1 = vmov 0   ;;  %v38_v2 = vld [vmem:[#allocation3 + $0x8] sm:$0xff]  ;;  %v40_v3 = vld [vmem:[#allocation3 + $0x18] sm:$0xff] }
  0x15   :  { %218 = vmatprep.mubr.f32.mxu0 %v436_v0  ;;  %364 = vset.pattern.permute.xlu0 %v437_v1  ;;  %v37_v4 = vld [vmem:[#allocation3] sm:$0xff]  ;;  %v75_v5 = vmul.f32 %v38_v2, %v38_v2  ;;  %v77_v6 = vmul.f32 %v40_v3, %v40_v3  ;;  %v323_v7 = vpack.c.bf16 %v40_v3, %v38_v2  ;;  %v39_v8 = vld [vmem:[#allocation3 + $0x10] sm:$0xff]  ;;  %v42_v10 = vld [vmem:[#allocation3 + $0x28] sm:$0xff]  ;;  %vm261_vm2 = vcmask 7168   ;;  %s273_s10 = smul.f32 0.99, %s539_s1 }
  0x16   :  { %v74_v9 = vmul.f32 %v37_v4, %v37_v4  ;;  %v44_v11 = vld [vmem:[#allocation3 + $0x38] sm:$0xff]  ;;  %v76_v12 = vmul.f32 %v39_v8, %v39_v8  ;;  %v325_v13 = vpack.c.bf16 %v39_v8, %v37_v4  ;;  %v79_v14 = vmul.f32 %v42_v10, %v42_v10  ;;  %v41_v15 = vld [vmem:[#allocation3 + $0x20] sm:$0xff]  ;;  %v43_v16 = vld [vmem:[#allocation3 + $0x30] sm:$0xff]  ;;  %s395_s16 = scalar_lea.hbm %s543_s5, 16 }
  0x17   :  { %v46_v17 = vld [vmem:[#allocation3 + $0x48] sm:$0xff]  ;;  %v127_v18 = vadd.f32 %v77_v6, %v75_v5  ;;  %324 = vmatprep.subr.bf16.mxu0 %v323_v7  ;;  %v81_v19 = vmul.f32 %v44_v11, %v44_v11  ;;  %v327_v20 = vpack.c.bf16 %v44_v11, %v42_v10  ;;  %v78_v21 = vmul.f32 %v41_v15, %v41_v15  ;;  %v48_v22 = vld [vmem:[#allocation3 + $0x58] sm:$0xff]  ;;  %v45_v29 = vld [vmem:[#allocation3 + $0x40] sm:$0xff]  ;;  %p396_p8 = scmp.ne.s32.totalorder %s543_s5, %s395_s16  ;;  %p399_p9 = scmp.lt.u32.totalorder %s395_s16, %s543_s5 }
  0x18   :  { %v106_v23 = vadd.f32 %v76_v12, %v74_v9  ;;  %326 = vmatpush1.bf16.msra.mxu0 %v325_v13  ;;  %v80_v24 = vmul.f32 %v43_v16, %v43_v16  ;;  %v329_v25 = vpack.c.bf16 %v43_v16, %v41_v15  ;;  %v83_v27 = vmul.f32 %v46_v17, %v46_v17  ;;  %v47_v30 = vld [vmem:[#allocation3 + $0x50] sm:$0xff]  ;;  %v50_v33 = vld [vmem:[#allocation3 + $0x68] sm:$0xff]  ;;  %v52_v34 = vld [vmem:[#allocation3 + $0x78] sm:$0xff] }
  0x19   :  { %v128_v26 = vadd.f32 %v127_v18, %v79_v14  ;;  %328 = vmatprep.subr.bf16.mxu0 %v327_v20  ;;  %v331_v28 = vpack.c.bf16 %v48_v22, %v46_v17  ;;  %v82_v32 = vmul.f32 %v45_v29, %v45_v29  ;;  %v85_v36 = vmul.f32 %v48_v22, %v48_v22  ;;  %v49_v43 = vld [vmem:[#allocation3 + $0x60] sm:$0xff]  ;;  %v51_v44 = vld [vmem:[#allocation3 + $0x70] sm:$0xff]  ;;  %v54_v47 = vld [vmem:[#allocation3 + $0x88] sm:$0xff]  ;;  %p401_p10 = pnand %p399_p9, %p396_p8 }
  0x1a   :  { %v107_v31 = vadd.f32 %v106_v23, %v78_v21  ;;  %v84_v38 = vmul.f32 %v47_v30, %v47_v30  ;;  %v333_v39 = vpack.c.bf16 %v47_v30, %v45_v29  ;;  %v87_v41 = vmul.f32 %v50_v33, %v50_v33  ;;  %v56_v48 = vld [vmem:[#allocation3 + $0x98] sm:$0xff]  ;;  %v53_v57 = vld [vmem:[#allocation3 + $0x80] sm:$0xff]  ;;  %v55_v58 = vld [vmem:[#allocation3 + $0x90] sm:$0xff] }
  0x1b   :  { %v129_v35 = vadd.f32 %v128_v26, %v81_v19  ;;  %v335_v42 = vpack.c.bf16 %v52_v34, %v50_v33  ;;  %v86_v46 = vmul.f32 %v49_v43, %v49_v43  ;;  %v89_v50 = vmul.f32 %v52_v34, %v52_v34  ;;  %v58_v61 = vld [vmem:[#allocation3 + $0xa8] sm:$0xff]  ;;  %v60_v62 = vld [vmem:[#allocation3 + $0xb8] sm:$0xff]  ;;  %v36_v1 = vld [vmem:[%s540_s2] sm:$0xff] }
  0x1c   :  { %v108_v37 = vadd.f32 %v107_v31, %v80_v24  ;;  %330 = vmatpush1.bf16.msra.mxu0 %v329_v25  ;;  %v88_v52 = vmul.f32 %v51_v44, %v51_v44  ;;  %v337_v53 = vpack.c.bf16 %v51_v44, %v49_v43  ;;  %v91_v55 = vmul.f32 %v54_v47, %v54_v47  ;;  %v57_v9 = vld [vmem:[#allocation3 + $0xa0] sm:$0xff]  ;;  %v59_v10 = vld [vmem:[#allocation3 + $0xb0] sm:$0xff]  ;;  %v62_v13 = vld [vmem:[#allocation3 + $0xc8] sm:$0xff] }
  0x1d   :  { %v130_v40 = vadd.f32 %v129_v35, %v83_v27  ;;  %332 = vmatprep.subr.bf16.mxu0 %v331_v28  ;;  %v339_v56 = vpack.c.bf16 %v56_v48, %v54_v47  ;;  %v90_v60 = vmul.f32 %v53_v57, %v53_v57  ;;  %v93_v0 = vmul.f32 %v56_v48, %v56_v48  ;;  %v64_v14 = vld [vmem:[#allocation3 + $0xd8] sm:$0xff]  ;;  %v61_v23 = vld [vmem:[#allocation3 + $0xc0] sm:$0xff]  ;;  %v63_v24 = vld [vmem:[#allocation3 + $0xd0] sm:$0xff] }
  0x1e   :  { %v109_v45 = vadd.f32 %v108_v37, %v82_v32  ;;  %v92_v3 = vmul.f32 %v55_v58, %v55_v58  ;;  %v341_v4 = vpack.c.bf16 %v55_v58, %v53_v57  ;;  %v71_v5 = vmul.f32 %v36_v1, %v36_v1  ;;  %v66_v27 = vld [vmem:[#allocation3 + $0xe8] sm:$0xff]  ;;  %v68_v28 = vld [vmem:[#allocation3 + $0xf8] sm:$0xff]  ;;  %v65_v37 = vld [vmem:[#allocation3 + $0xe0] sm:$0xff] }
  0x1f   :  { %v131_v49 = vadd.f32 %v130_v40, %v85_v36  ;;  %v95_v7 = vmul.f32 %v58_v61, %v58_v61  ;;  %v343_v8 = vpack.c.bf16 %v60_v62, %v58_v61  ;;  %v94_v12 = vmul.f32 %v57_v9, %v57_v9 }
  0x20   :  { %v110_v51 = vadd.f32 %v109_v45, %v84_v38  ;;  %334 = vmatpush1.bf16.msra.mxu0 %v333_v39  ;;  %72 = vadd.xlane.f32.xlu0 %v71_v5  ;;  %v97_v16 = vmul.f32 %v60_v62, %v60_v62  ;;  %v96_v18 = vmul.f32 %v59_v10, %v59_v10  ;;  %v67_v38 = vld [vmem:[#allocation3 + $0xf0] sm:$0xff] }
  0x21   :  { %v132_v54 = vadd.f32 %v131_v49, %v87_v41  ;;  %336 = vmatprep.subr.bf16.mxu0 %v335_v42  ;;  %v345_v19 = vpack.c.bf16 %v59_v10, %v57_v9  ;;  %v99_v21 = vmul.f32 %v62_v13, %v62_v13  ;;  %v347_v22 = vpack.c.bf16 %v64_v14, %v62_v13 }
  0x22   :  { %v111_v59 = vadd.f32 %v110_v51, %v86_v46  ;;  %v98_v26 = vmul.f32 %v61_v23, %v61_v23  ;;  %v101_v30 = vmul.f32 %v64_v14, %v64_v14  ;;  %v100_v32 = vmul.f32 %v63_v24, %v63_v24 }
  0x23   :  { %v133_v63 = vadd.f32 %v132_v54, %v89_v50  ;;  %v349_v33 = vpack.c.bf16 %v63_v24, %v61_v23  ;;  %v103_v35 = vmul.f32 %v66_v27, %v66_v27  ;;  %v351_v36 = vpack.c.bf16 %v68_v28, %v66_v27  ;;  %v69_v50 = vld [vmem:[%s538_s0] sm:$0xff] }
  0x24   :  { %v112_v2 = vadd.f32 %v111_v59, %v88_v52  ;;  %338 = vmatpush1.bf16.msra.mxu0 %v337_v53  ;;  %v102_v40 = vmul.f32 %v65_v37, %v65_v37  ;;  %v105_v42 = vmul.f32 %v68_v28, %v68_v28  ;;  %v104_v44 = vmul.f32 %v67_v38, %v67_v38 }
  0x25   :  { %v134_v6 = vadd.f32 %v133_v63, %v91_v55  ;;  %340 = vmatprep.subr.bf16.mxu0 %v339_v56  ;;  %v353_v45 = vpack.c.bf16 %v67_v38, %v65_v37 }
  0x26   :  { %v113_v11 = vadd.f32 %v112_v2, %v90_v60 }
  0x27   :  { %v135_v15 = vadd.f32 %v134_v6, %v93_v0 }
  0x28   :  { %v114_v17 = vadd.f32 %v113_v11, %v92_v3  ;;  %342 = vmatpush1.bf16.msra.mxu0 %v341_v4  ;;  %v233_v3 = vlaneseq }
  0x29   :  { %v136_v20 = vadd.f32 %v135_v15, %v95_v7  ;;  %344 = vmatprep.subr.bf16.mxu0 %v343_v8 }
  0x2a   :  { %v115_v25 = vadd.f32 %v114_v17, %v94_v12  ;;  %v488_v4 = vand.u32 127, %v233_v3 }
  0x2b   :  { %v137_v29 = vadd.f32 %v136_v20, %v97_v16 }
  0x2c   :  { %v116_v31 = vadd.f32 %v115_v25, %v96_v18  ;;  %346 = vmatpush1.bf16.msra.mxu0 %v345_v19  ;;  %v491_v11 = vadd.s32 128, %v488_v4 }
  0x2d   :  { %v138_v34 = vadd.f32 %v137_v29, %v99_v21  ;;  %348 = vmatprep.subr.bf16.mxu0 %v347_v22 }
  0x2e   :  { %v117_v39 = vadd.f32 %v116_v31, %v98_v26 }
  0x2f   :  { %v139_v41 = vadd.f32 %v138_v34, %v101_v30 }
  0x30   :  { %v118_v43 = vadd.f32 %v117_v39, %v100_v32  ;;  %350 = vmatpush1.bf16.msra.mxu0 %v349_v33 }
  0x31   :  { %v140_v46 = vadd.f32 %v139_v41, %v103_v35  ;;  %352 = vmatprep.subr.bf16.mxu0 %v351_v36 }
  0x32   :  { %v119_v47 = vadd.f32 %v118_v43, %v102_v40 }
  0x33   :  { %v141_v48 = vadd.f32 %v140_v46, %v105_v42 }
  0x34   :  { %v120_v49 = vadd.f32 %v119_v47, %v104_v44  ;;  %354 = vmatpush1.bf16.msra.mxu0 %v353_v45 }
  0x35   :  { %v142_v52 = vrot.slane %v141_v48, 4 }
  0x36   :  { %237 = vperm.xlu0 %364, %v69_v50   ;;  %v121_v51 = vrot.slane %v120_v49, 4 }
  0x37   :  { %219 = vmatmul.mubr.f32.vlgmr.msra.gmra.mrb[0].mxu0 %v36_v1  ;;  %v143_v54 = vadd.f32 %v142_v52, %v141_v48 }
  0x38   :  { %v122_v53 = vadd.f32 %v121_v51, %v120_v49 }
  0x39   :  { %v144_v56 = vrot.slane %v143_v54, 2 }
  0x3a   :  { %v123_v55 = vrot.slane %v122_v53, 2 }
  0x3b   :  { %v145_v58 = vadd.f32 %v144_v56, %v143_v54 }
  0x3c   :  { %v124_v57 = vadd.f32 %v123_v55, %v122_v53 }
  0x3d   :  { %v146_v60 = vrot.slane %v145_v58, 1 }
  0x3e   :  { %v125_v59 = vrot.slane %v124_v57, 1 }
  0x3f   :  { %v147_v63 = vadd.f32 %v146_v60, %v145_v58 }
  0x40   :  { %v126_v62 = vadd.f32 %v125_v59, %v124_v57 }
  0x41   :  { %v151_v2 = vmax.f32 %v147_v63, 1e-24 }
  0x42   :  { %v150_v1 = vmax.f32 %v126_v62, 1e-24 }
  0xad   :  { %v73_v61 = vpop.xlane.xlu0 %72 }
  0xae   :  { %v148_v0 = vmax.f32 %v73_v61, 1e-24 }
  0xb0   :  { %365 = vrsqrt.f32 %v148_v0 }
  0xb1   :  { %367 = vrsqrt.f32 %v150_v1 }
  0xb2   :  { %369 = vrsqrt.f32 %v151_v2 }
  0xb5   :  { %v493_v12 = vpop.permute.xlu0 %237 }
  0xb6   :  { %vm239_vm0 = vcmp.eq.s32.totalorder %v488_v4, %v493_v12  ;;  %vm240_vm1 = vcmp.eq.s32.totalorder %v491_v11, %v493_v12 }
  0xba   :  { %v366_v5 = vpop.eup %365 }
  0xbb   :  { %v368_v6 = vpop.eup %367 }
  0xbc   :  { %v370_v8 = vpop.eup %369 }
 0x10a   :  { %v220_v7 = vpop.f32.mrb[0].mxu0 }
 0x10b   :  { %v225_v9 = vmul.f32 %v366_v5, %v220_v7  ;;  %v222_v10 = vpop.f32.mrb[1].mxu0 }
 0x10c   :  { %v226_v13 = vmul.f32 %v366_v5, %v222_v10 }
 0x10d   :  { %v227_v14 = vmul.f32 %v368_v6, %v225_v9 }
 0x10e   :  { %v228_v15 = vmul.f32 %v370_v8, %v226_v13 }
 0x10f   :  { %v320_v16 = vclamps-f32 %v227_v14, 1.0 }
 0x110   :  { %v321_v17 = vclamps-f32 %v228_v15, 1.0 }
 0x111   :  { %v241_v18 = vsel %vm239_vm0, %v320_v16, 0.0 }
 0x112   :  { %v242_v19 = vsel %vm240_vm1, %v321_v17, 0.0 }
 0x113   :  { %v243_v20 = vadd.f32 %v242_v19, %v241_v18 }
 0x115   :  { %244 = vadd.xlane.f32.xlu1 %v243_v20 }
 0x1a2   :  { %v245_v21 = vpop.xlane.xlu1 %244 }
 0x1a3   :  { %v262_v22 = vsel %vm261_vm2, %v245_v21, 0.0  ;;  %v246_v30 = vmul.f32 %v245_v21, %v245_v21  ;;  %v255_v38 = vmul.f32 0.87758255, %v245_v21 }
 0x1a4   :  { %263 = vadd.xlane.f32.xlu1 %v262_v22 }
 0x1a5   :  { %v247_v31 = vsub.f32 1.0, %v246_v30 }
 0x1a7   :  { %371 = vrsqrt.f32 %v247_v31  ;;  %vm250_vm3 = vcmp.eq.f32.partialorder %v247_v31, inf  ;;  %v253_v35 = vand.u32 2147483648, %v247_v31  ;;  %vm252_vm4 = vcmp.eq.f32.partialorder %v247_v31, 0.0 }
 0x1b1   :  { %v372_v32 = vpop.eup %371 }
 0x1b2   :  { %v249_v33 = vmul.f32 %v372_v32, %v247_v31 }
 0x1b4   :  { %v251_v34 = vsel %vm250_vm3, %v247_v31, %v249_v33 }
 0x1b5   :  { %v254_v36 = vsel %vm252_vm4, %v253_v35, %v251_v34 }
 0x1b6   :  { %v256_v37 = vmul.f32 0.47942555, %v254_v36 }
 0x1b8   :  { %v257_v39 = vsub.f32 %v255_v38, %v256_v37 }
 0x231   :  { %v264_v23 = vpop.xlane.xlu1 %263 }
 0x232   :  { %v265_v24 = vrot.slane %v264_v23, 4 }
 0x234   :  { %v266_v25 = vadd.f32 %v265_v24, %v264_v23 }
 0x236   :  { %v267_v26 = vrot.slane %v266_v25, 2 }
 0x238   :  { %v268_v27 = vadd.f32 %v267_v26, %v266_v25 }
 0x23a   :  { %v269_v28 = vrot.slane %v268_v27, 1 }
 0x23c   :  { %v270_v29 = vadd.f32 %v269_v28, %v268_v27 }
 0x23e   :  { %355 = vpush %v270_v29 }
 0x26f   :  { %s356_s11 = spop %355 }
 0x270   :  { %s272_s12 = smul.f32 0.00125, %s356_s11 }
 0x272   :  { %s274_s13 = sadd.f32 %s273_s10, %s272_s12 }
 0x274   :  { %v277_v40 = vstv %s274_s13  ;;  %291 = sst [smem:[#allocation8]] %s274_s13 }
 0x275   :  { %v278_v41 = vadd.f32 %v320_v16, %v277_v40  ;;  %v279_v42 = vadd.f32 %v321_v17, %v277_v40 }
 0x276   :  { %404 = shalt.err (!%p401_p10)
}
 0x277   :  { %s438_s20 = smov [#allocation8]   ;;  %v322_v43 = vadd.f32 -0.23971277, %v245_v21  ;;  %v280_v44 = vmul.f32 %v320_v16, %v278_v41  ;;  %v281_v45 = vmul.f32 %v321_v17, %v279_v42  ;;  %vm258_vm5 = vcmp.gt.f32.partialorder %v245_v21, -0.87758255  ;;  %s439_s23 = smov [#allocation7]  }
 0x278   :  { %309 = dma.smem_to_hbm %s438_s20, 16, %s543_s5, [#allocation6]   ;;  %vm275_vm6 = vcmp.gt.f32.partialorder %v320_v16, %v257_v39  ;;  %vm276_vm7 = vcmp.gt.f32.partialorder %v321_v17, %v257_v39 }
 0x279   :  { %s298_s24 = sshll.u32 %s439_s23, 4  ;;  %v260_v46 = vsel %vm258_vm5, %v257_v39, %v322_v43  ;;  %v282_v47 = vsel %vm275_vm6, %v280_v44, %v320_v16  ;;  %v283_v48 = vsel %vm276_vm7, %v281_v45, %v321_v17  ;;  %s299_s24 = int_to_ptr.vmem [resolvable:$true] %s298_s24 }
 0x27a   :  { %v284_v49 = vsel %vm239_vm0, %v260_v46, %v282_v47  ;;  %v285_v50 = vsel %vm240_vm1, %v260_v46, %v283_v48  ;;  %s405_s5 = scalar_lea.vmem %s299_s24, 256  ;;  %p410_p12 = scmp.lt.s32.totalorder %s299_s24, %s299_s24 }
 0x27b   :  { %v286_v51 = vmul.f32 64.0, %v284_v49  ;;  %v287_v52 = vmul.f32 64.0, %v285_v50  ;;  %p406_p11 = scmp.ne.s32.totalorder %s299_s24, %s405_s5  ;;  %p411_p13 = scmp.lt.s32.totalorder %s405_s5, %s405_s5 }
 0x27d   :  { %288 = vst [vmem:[#allocation7] sm:$0xff] %v286_v51  ;;  %289 = vst [vmem:[#allocation7 + $0x8] sm:$0xff] %v287_v52  ;;  %p412_p0 = por %p411_p13, %p410_p12 }
 0x27f   :  { %p413_p1 = pnand %p412_p0, %p406_p11 }
 0x281   :  { %416 = shalt.err (!%p413_p1)
}
 0x282   :  { %s417_s27 = scalar_lea.hbm %s542_s4, 256 }
 0x283   :  { %p418_p2 = scmp.ne.s32.totalorder %s542_s4, %s417_s27  ;;  %p421_p3 = scmp.lt.u32.totalorder %s417_s27, %s542_s4 }
 0x285   :  { %p423_p4 = pnand %p421_p3, %p418_p2 }
 0x287   :  { %426 = shalt.err (!%p423_p4)
}
 0x288   :  { %301 = dma.vmem_to_hbm [thread:$0]  %s299_s24, 256, %s542_s4, [#allocation5]  }
 0x289   :  { %429 = dma.done.wait [#allocation5], 256  }
 0x28a   :  { %430 = vsyncadd [#allocation5], 4294967040 }
 0x28b   :  { %431 = dma.done.wait [#allocation6], 16  }
 0x28c   :  { %432 = vsyncadd [#allocation6], 4294967280 }
 0x28d   :  { %316 = sfence }
 0x28e   :  { %317 = vsyncpa [#allocation4], 1 }
 0x28f   :  { %318 = vsyncpa [#allocation5], 1 }
 0x290   :  { %319 = vsyncpa [#allocation6], 1 }

</bundles_post_ra>
